<compile_context>
chip_gen: v7x
topology: tpu7x:2x2x1
jax: 0.10.0
libtpu: 0.0.40
codegen_flags: <defaults>
</compile_context>

<pallas_src>
import jax
import jax.numpy as jnp
from jax import lax
from jax.experimental import pallas as pl
from jax.experimental.pallas import tpu as pltpu


# adj[b, i, j] = sum_k bt[b, k, i] * bt[b, k, j]
_CONTRACT_DIM1 = (((1,), (1,)), ((0,), (0,)))


def _adj_kernel(bi_ref, bj_ref, adj_ref):
    # bi_ref: (bb, K, tm), bj_ref: (bb, K, tn) -> adj_ref: (bb, tm, tn)
    adj = lax.dot_general(bi_ref[...], bj_ref[...], _CONTRACT_DIM1,
                          preferred_element_type=jnp.float32)
    adj_ref[...] = adj.astype(adj_ref.dtype)


def _adj_kernel_dedup(bt_ref, adj_ref):
    # Full-slab path: one input ref feeds both operands.
    bt = bt_ref[...]
    adj = lax.dot_general(bt, bt, _CONTRACT_DIM1,
                          preferred_element_type=jnp.float32)
    adj_ref[...] = adj.astype(adj_ref.dtype)


def _round_up(n, m):
    return ((n + m - 1) // m) * m


def _largest_divisor_leq(n, cap):
    cap = max(1, min(n, cap))
    for d in range(cap, 0, -1):
        if n % d == 0:
            return d
    return 1


def _largest_divisor_multiple_of(n, mult, cap):
    """Largest d | n with d % mult == 0 and d <= cap, else None."""
    cap = min(n, cap)
    d = cap - (cap % mult)
    while d >= mult:
        if n % d == 0:
            return d
        d -= mult
    return None


def _padded_tile_bytes(shape, dtype):
    """VMEM bytes of one buffered block (sublane/lane padding of last 2 dims)."""
    itemsize = jnp.dtype(dtype).itemsize
    sublane = 8 * max(1, 4 // itemsize)           # f32->8, bf16->16, int8->32
    *lead, second, last = shape
    b = _round_up(second, sublane) * _round_up(last, 128) * itemsize
    for d in lead:
        b *= d
    return b


def _vmem_capacity_bytes():
    try:
        cap = getattr(pltpu.get_tpu_info(), "vmem_capacity_bytes", None)
        if cap:
            return int(cap)
    except Exception:
        pass
    return 64 * 1024 * 1024                       # conservative: v7x per-TC VMEM


def adjacency_matrix(x, n_class):
    """x: (B, d1, d2) -> adj: (B, M, M) with M = d1*d2 // n_class."""
    B, d1, d2 = x.shape
    assert (d1 * d2) % n_class == 0, "d1*d2 must be divisible by n_class"
    K = n_class
    M = (d1 * d2) // K
    out_dtype = x.dtype
    itemsize = jnp.dtype(x.dtype).itemsize

    bin_ = x.reshape(B, M, K)                     # row-major == torch .view
    bt = jnp.swapaxes(bin_, 1, 2)                 # (B, K, M): M on the lane axis

    # --- generation-aware VMEM budget for the live double-buffered blocks ----
    vmem_cap = _vmem_capacity_bytes()             # 64 MiB v7x, 128 MiB v5e/v6e
    budget = min(vmem_cap // 2, 48 * 1024 * 1024)

    def per_batch_bytes(tm, tn, dedup):
        in_i = _padded_tile_bytes((K, tm), x.dtype)
        in_j = 0 if dedup else _padded_tile_bytes((K, tn), x.dtype)
        out = _padded_tile_bytes((tm, tn), out_dtype)
        return in_i + in_j + out

    # --- output tiling: lane-dense (tn % 128 == 0) wide rectangles -----------
    lane_ok = (M % 128 == 0)
    if lane_ok:
        if M <= 512:
            tm = tn = M                           # full slab, still lane-dense
        else:
            tm = 256 if M % 256 == 0 else 128
            tn = M if M <= 2048 else (_largest_divisor_multiple_of(M, 128, 2048) or 128)
    else:
        # Full (M, M) slab: block dims == array dims is always legal.
        # A flattened (B, M*M) lane-dense store would need an in-kernel
        # (bb, M, M) -> (bb, M*M) reshape, which does not lower cleanly when
        # M % 128 != 0, so it is intentionally not used here.
        tm = tn = M

    # --- batches per step from the accurate double-buffered footprint --------
    dedup = (tm == M and tn == M)
    bb_cap = max(1, budget // max(1, 2 * per_batch_bytes(tm, tn, dedup)))
    bb = _largest_divisor_leq(B, bb_cap)

    # --- megacore (v7x: 2 TCs): keep at least 2 independent grid blocks ------
    if (B // bb) * (M // tm) * (M // tn) < 2:
        if B >= 2:
            bb = _largest_divisor_leq(B, B // 2)
        elif lane_ok and M >= 256:
            tm = M // 2                           # multiple of 64 -> sublane ok
            dedup = False

    grid = (B // bb, M // tm, M // tn)
    footprint = 2 * bb * per_batch_bytes(tm, tn, dedup)
    vmem_limit = int(min(vmem_cap * 3 // 4,
                         max(32 * 1024 * 1024, footprint + 8 * 1024 * 1024)))

    out_spec = pl.BlockSpec((bb, tm, tn), lambda b, i, j: (b, i, j))
    if dedup:
        kernel = _adj_kernel_dedup
        in_specs = [pl.BlockSpec((bb, K, M), lambda b, i, j: (b, 0, 0))]
        args = (bt,)
    else:
        kernel = _adj_kernel
        in_specs = [
            pl.BlockSpec((bb, K, tm), lambda b, i, j: (b, 0, i)),   # row block
            pl.BlockSpec((bb, K, tn), lambda b, i, j: (b, 0, j)),   # col block
        ]
        args = (bt, bt)

    cost = pl.CostEstimate(
        flops=2 * B * M * M * K,
        bytes_accessed=B * M * M * itemsize + 2 * B * M * K * itemsize,
        transcendentals=0,
    )

    return pl.pallas_call(
        kernel,
        out_shape=jax.ShapeDtypeStruct((B, M, M), out_dtype),
        grid_spec=pltpu.PrefetchScalarGridSpec(
            num_scalar_prefetch=0,
            grid=grid,
            in_specs=in_specs,
            out_specs=out_spec,
        ),
        compiler_params=pltpu.CompilerParams(
            dimension_semantics=("parallel", "parallel", "parallel"),
            vmem_limit_bytes=vmem_limit,
        ),
        cost_estimate=cost,
    )(*args)


if __name__ == "__main__":
    n_class = 4
    B, d1, d2 = 2, 16, 16                         # -> M = 64, K = 4

    key = jax.random.PRNGKey(0)
    x = jax.random.normal(key, (B, d1, d2), dtype=jnp.float32)

    adj = jax.block_until_ready(adjacency_matrix(x, n_class))

    # reference check (plain JAX)
    bin_ref = x.reshape(B, -1, n_class)
    adj_ref = jnp.einsum("bij,bkj->bik", bin_ref, bin_ref)
    assert adj.shape == (B, d1 * d2 // n_class, d1 * d2 // n_class)
    assert adj.dtype == x.dtype
    assert jnp.allclose(adj, adj_ref, atol=1e-5, rtol=1e-5)

    print("KERNEL_OK")
</pallas_src>

<mosaic_0001>
module attributes {stable_mosaic.version = 11 : i64} {
  func.func @_adj_kernel_dedup(%arg0: i32, %arg1: i32, %arg2: i32, %arg3: memref<1x4x64xf32, #tpu.memory_space<vmem>>, %arg4: memref<1x64x64xf32, #tpu.memory_space<vmem>>) attributes {dimension_semantics = [#tpu.dimension_semantics<parallel>, #tpu.dimension_semantics<parallel>, #tpu.dimension_semantics<parallel>], iteration_bounds = array<i64: 2, 1, 1>, scalar_prefetch = 0 : i64, scratch_operands = 0 : i64, tpu.core_type = #tpu.core_type<tc>, window_params = [{transform_indices = @transform_0, window_bounds = array<i64: 1, 4, 64>}, {transform_indices = @transform_1, window_bounds = array<i64: 1, 64, 64>}]} {
    %c0 = arith.constant 0 : index
    %c0_0 = arith.constant 0 : index
    %c0_1 = arith.constant 0 : index
    %0 = vector.load %arg3[%c0, %c0_0, %c0_1] : memref<1x4x64xf32, #tpu.memory_space<vmem>>, vector<1x4x64xf32>
    %cst = arith.constant dense<0.000000e+00> : vector<1x64x64xf32>
    %1 = tpu.matmul %0, %0, %cst {dimension_numbers = #tpu.dot_dimension_numbers<[1], [1], [2], [2], [0, 0, 0, 2, 1, 2], [0], [0]>} : vector<1x4x64xf32>, vector<1x4x64xf32>, vector<1x64x64xf32> -> vector<1x64x64xf32>
    %c0_2 = arith.constant 0 : index
    %c0_3 = arith.constant 0 : index
    %c0_4 = arith.constant 0 : index
    %2 = vector.load %arg4[%c0_2, %c0_3, %c0_4] : memref<1x64x64xf32, #tpu.memory_space<vmem>>, vector<1x64x64xf32>
    tpu.vector_store %arg4[%c0_2, %c0_3, %c0_4], %1 {strides = array<i32>} : memref<1x64x64xf32, #tpu.memory_space<vmem>>, vector<1x64x64xf32>,
    return
  }
  func.func @transform_0(%arg0: i32, %arg1: i32, %arg2: i32) -> (i32, i32, i32) {
    %c0_i32 = arith.constant 0 : i32
    %c0_i32_0 = arith.constant 0 : i32
    %c0_i32_1 = arith.constant 0 : i32
    return %arg0, %c0_i32, %c0_i32_0 : i32, i32, i32
  }
  func.func @transform_1(%arg0: i32, %arg1: i32, %arg2: i32) -> (i32, i32, i32) {
    %c0_i32 = arith.constant 0 : i32
    return %arg0, %arg1, %arg2 : i32, i32, i32
  }
}

</mosaic_0001>

<bundles_post_ra>
// kernel: tpu_custom_call.1
= control target key start
LH: loop header
LB: loop body
LE: loop exit
PB: predicated region body
PF: predicated region fallthrough
CT: control target
= control target key end

     0   :  { %6 = vsyncpa [#allocation3], 0  ;;  %s870_s0 = inlined_call_operand.hbm [shape: f32[2,4,64], index: 0, kind: input, shape index: {}]   ;;  %s871_s1 = inlined_call_operand.hbm [shape: f32[2,64,64], index: 1, kind: output, shape index: {}]  }
   0x1   :  { %8 = vsyncpa [#allocation3 + $0x1], 0 }
   0x2   :  { %9 = vsyncpa [#allocation4], 0 }
   0x3   :  { %11 = vsyncpa [#allocation4 + $0x1], 0  ;;  %s679_s6 = smov 0   ;;  %s681_s7 = smov 0  }
   0x4   :  { %s683_s8 = smov 0   ;;  %s685_s9 = smov 0  }
   0x5   :  { %s687_s10 = smov 0   ;;  %s689_s11 = smov 0  }
   0x6 LB: > { %s437_s12 = sadd.s32 4294967295, %s663_s11   ;;  %s438_s13 = sadd.s32 4294967294, %s663_s11   ;;  %s663_s11 = sphi %s689_s11, %s17_s11   ;;  %s659_s10 = sphi %s687_s10, %s887_s10   ;;  %s655_s9 = sphi %s685_s9, %s886_s9   ;;  %s651_s8 = sphi %s683_s8, %s885_s8   ;;  %s647_s7 = sphi %s681_s7, %s884_s7   ;;  %s643_s6 = sphi %s679_s6, %s883_s6  }
   0x7   : > { %s36_s14 = sadd.s32 1, %s659_s10  ;;  %s43_s15 = sadd.s32 1, %s651_s8 }
   0x8   : > { %p38_p0 = scmp.ge.s32.totalorder %s36_s14, 2  ;;  %p50_p1 = scmp.ne.s32.totalorder %s651_s8, %s647_s7 }
   0x9   : > { %p51_p2 = scmp.eq.s32.totalorder %s663_s11, 0  ;;  %p56_p3 = scmp.ne.s32.totalorder %s647_s7, %s643_s6 }
   0xa   : > { %s889_s14 = smov (%p38_p0, %s36_s14), 0  ;;  %p57_p5 = scmp.eq.s32.totalorder %s437_s12, 0 }
   0xb   : > { %p720_p4 = por %p51_p2, %p50_p1  ;;  %s40_s17 = ssub.s32 %s659_s10, %s889_s14 }
   0xc   : > { %p84_p6 = scmp.eq.s32.totalorder %s437_s12, 1  ;;  %p41_p7 = scmp.eq.s32.totalorder %s40_s17, 0 }
   0xd   : > { %p726_p8 = por %p57_p5, %p56_p3  ;;  %p90_p10 = scmp.eq.s32.totalorder %s438_s13, 1 }
   0xe   : > { %p730_p9 = por %p84_p6, %p50_p1  ;;  %p498_p13 = scmp.lt.s32.totalorder %s663_s11, 2 }
   0xf   : > { %s735_s20 = scalar_select %p41_p7, %s651_s8, %s43_s15  }
  0x10   : > { %s875_s19 = scalar_select %p730_p9, 1, 0 }
  0x11   : > { %p737_p11 = por %p90_p10, %p56_p3  ;;  %s110_s22 = sand.u32 1, %s651_s8  }
  0x12   : > { %s441_s23 = sshll.u32 %s110_s22, 2  ;;  %s442_s24 = sshll.u32 %s659_s10, 6 }
  0x13   : > { %s876_s21 = scalar_select %p737_p11, 1, 0 }
  0x14   : > { %s748_s27 = scalar_lea.hbm %s870_s0, %s442_s24  ;;  %s114_s28 = scalar_lea.vmem [#allocation2], %s441_s23 }
  0x15   : > { %s121_s29 = sshll.u32 %s114_s28, 4  ;;  %p754_p0 = pnand %p498_p13, %p720_p4  ;;  %s750_s29 = int_to_ptr.vmem [resolvable:$true] %s121_s29 }
  0x16   : > { %s111_s2 = scalar_lea.sflag [#allocation3], %s110_s22  ;;  %s551_s3 = scalar_lea.hbm %s748_s27, 64 }
  0x17   : > { %p552_p3 = scmp.ne.s32.totalorder %s748_s27, %s551_s3  ;;  %p553_p5 = pneg %p754_p0 }
  0x18   : > { %s556_s12 = scalar_lea.hbm %s870_s0, 128  ;;  %p557_p4 = scmp.lt.u32.totalorder %s748_s27, %s870_s0 }
  0x19   : > { %p554_p6 = pnand %p553_p5, %p552_p3  ;;  %p558_p10 = scmp.lt.u32.totalorder %s556_s12, %s551_s3 }
  0x1a   : > { %p560_p12 = scmp.lt.u32.totalorder %s551_s3, %s748_s27 }
  0x1b   : > { %p555_p7 = pneg %p554_p6  ;;  %p559_p13 = por %p558_p10, %p557_p4 }
  0x1d   : > { %p561_p1 = por %p560_p12, %p559_p13 }
  0x1f   : > { %p562_p2 = pnand %p561_p1, %p555_p7 }
  0x21   : > { %565 = shalt.err (!%p562_p2)
}
  0x22   : > { %s566_s16 = scalar_lea.vmem %s750_s29, 64  ;;  %s665_s17 = smov [#allocation2]  }
  0x23   : > { %p567_p3 = scmp.ne.s32.totalorder %s750_s29, %s566_s16  ;;  %s571_s22 = sshll.u32 %s665_s17, 4  ;;  %s572_s22 = int_to_ptr.vmem [resolvable:$false] %s571_s22 }
  0x24   : > { %s573_s23 = scalar_lea.vmem %s572_s22, 128  ;;  %p574_p9 = scmp.lt.s32.totalorder %s750_s29, %s572_s22 }
  0x25   : > { %p569_p6 = pnand %p567_p3, %p553_p5  ;;  %p575_p4 = scmp.lt.s32.totalorder %s573_s23, %s566_s16 }
  0x27   : > { %p570_p11 = pneg %p569_p6  ;;  %p576_p10 = por %p575_p4, %p574_p9 }
  0x29   : > { %p577_p12 = pnand %p576_p10, %p570_p11 }
  0x2b   : > { %580 = shalt.err (!%p577_p12)
}
  0x2c   : > { %493 = dma.hbm_to_vmem [thread:$0]  (!%p754_p0), %s748_s27, 64, %s750_s29, %s111_s2  }
  0x2d   : > { %p878_p1 = scmp.lt.s32.totalorder %s663_s11, 3  ;;  %p879_p2 = scmp.ge.s32.totalorder %s663_s11, 1 }
  0x2f   : > { %p127_p5 = pnand %p879_p2, %p878_p1 }
  0x30   : > { %s790_s24 = sand.u32 (!%p127_p5), 1, %s647_s7  }
  0x31   : > { %130 = sbr.rel (%p127_p5) target bundleno = 443 (0x1bb), region = 24  ;;  %s444_s25 = sshll.u32 (!%p127_p5), %s790_s24, 2 }
  0x32   : > { %s133_s26 = scalar_lea.sflag (!%p127_p5), [#allocation3], %s790_s24  ;;  %s136_s28 = scalar_lea.vmem (!%p127_p5), [#allocation2], %s444_s25 }
  0x38   : > { %634 = dma.done.wait (%p726_p8), %s133_s26, 64  }
  0x39   : > { %636 = vsyncadd (%p726_p8), %s133_s26, 4294967232  ;;  %v156_v0 = vld [vmem:[%s136_s28] sm:$0xf]  ;;  %vm214_vm0 = vcmask 1043456   ;;  %vm189_vm1 = vcmask 31744   ;;  %s445_s18 = sshll.u32 %s790_s24, 6 }
  0x3a   : > { %157 = vxpose.xlu0.b32.start.end [1/1] (short) (narrow) %v156_v0, 64  ;;  %470 = vmatprep.subr.msk.mxu0 %vm214_vm0, %v156_v0  ;;  %vm323_vm2 = vcmask 523264   ;;  %s154_s27 = scalar_lea.vmem [#allocation5], %s445_s18  ;;  %s460_s30 = sshll.u32 %s655_s9, 10 }
  0x3b   : > { %484 = vmatprep.subr.msk.mxu1 %vm214_vm0, %v156_v0  ;;  %471 = vmatpush3.msk.msra.mxu0 %vm214_vm0, %v156_v0  ;;  %s349_s29 = sshll.u32 %s154_s27, 4  ;;  %s819_s4 = scalar_lea.hbm %s871_s1, %s460_s30  ;;  %s814_s29 = int_to_ptr.vmem [resolvable:$true] %s349_s29 }
  0x3c   : > { %485 = vmatpush3.msk.msra.mxu1 %vm214_vm0, %v156_v0  ;;  %s333_s5 = scalar_lea.sflag [#allocation4], %s790_s24  ;;  %s581_s12 = scalar_lea.vmem %s814_s29, 1024 }
  0x3d   : > { %p582_p8 = scmp.ne.s32.totalorder %s814_s29, %s581_s12  ;;  %p880_p9 = scmp.ne.s32.totalorder %s875_s19, 0 }
  0x3e   : > { %s666_s9 = smov [#allocation5]  }
  0x3f   : > { %p583_p11 = pnand %p582_p8, %p880_p9  ;;  %s585_s13 = sshll.u32 %s666_s9, 4  ;;  %s586_s13 = int_to_ptr.vmem [resolvable:$false] %s585_s13 }
  0x40   : > { %s587_s15 = scalar_lea.vmem %s586_s13, 2048  ;;  %p588_p7 = scmp.lt.s32.totalorder %s814_s29, %s586_s13 }
  0x41   : > { %p584_p0 = pneg %p583_p11  ;;  %p589_p13 = scmp.lt.s32.totalorder %s587_s15, %s581_s12 }
  0x43   : > { %p590_p3 = por %p589_p13, %p588_p7 }
  0x45   : > { %p591_p6 = pnand %p590_p3, %p584_p0 }
  0xba   : > { %v173_v1 = vpop.trf.xlu0 }
  0xbb   : > { %472 = vmatprep.mubr.msk.f32.mxu0 %vm189_vm1, %v173_v1 }
  0xbe   : > { %v174_v2 = vpop.trf.xlu0 }
  0xbf   : > { %473 = vmatmul.mubr.msk.f32.vlgmr.msra.gmra.mrb[0].mxu0 %vm189_vm1, %v174_v2 }
  0xc2   : > { %v175_v3 = vpop.trf.xlu0 }
  0xc3   : > { %475 = vmatprep.mubr.msk.f32.mxu0 %vm189_vm1, %v175_v3 }
  0xc6   : > { %v176_v4 = vpop.trf.xlu0 }
  0xc7   : > { %476 = vmatmul.mubr.msk.f32.gmra.mrb[2].mxu0 %vm189_vm1, %v176_v4 }
  0xca   : > { %v177_v5 = vpop.trf.xlu0 }
  0xcb   : > { %478 = vmatprep.mubr.msk.f32.mxu1 %vm189_vm1, %v177_v5 }
  0xce   : > { %v178_v6 = vpop.trf.xlu0 }
  0xcf   : > { %479 = vmatmul.mubr.msk.f32.vlgmr.msra.gmra.mrb[0].mxu1 %vm189_vm1, %v178_v6 }
  0xd2   : > { %v179_v7 = vpop.trf.xlu0 }
  0xd3   : > { %481 = vmatprep.mubr.msk.f32.mxu1 %vm189_vm1, %v179_v7 }
  0xd6   : > { %v180_v8 = vpop.trf.xlu0 }
  0xd7   : > { %482 = vmatmul.mubr.msk.f32.gmra.mrb[2].mxu1 %vm189_vm1, %v180_v8 }
 0x192   : > { %v474_v9 = vpop.f32.mrb[0].mxu0 }
 0x193   : > { %325 = vst.msk [vmem:[%s154_s27 + $0x8] sm:$0xff] %vm323_vm2, %v474_v9  ;;  %v284_v10 = vpop.f32.mrb[1].mxu0 }
 0x194   : > { %324 = vst.msk [vmem:[%s154_s27] sm:$0xff] %vm323_vm2, %v284_v10 }
 0x19a   : > { %v477_v11 = vpop.f32.mrb[2].mxu0 }
 0x19b   : > { %327 = vst.msk [vmem:[%s154_s27 + $0x18] sm:$0xff] %vm323_vm2, %v477_v11  ;;  %v294_v12 = vpop.f32.mrb[3].mxu0 }
 0x19c   : > { %326 = vst.msk [vmem:[%s154_s27 + $0x10] sm:$0xff] %vm323_vm2, %v294_v12 }
 0x1a2   : > { %v480_v13 = vpop.f32.mrb[0].mxu1 }
 0x1a3   : > { %329 = vst.msk [vmem:[%s154_s27 + $0x28] sm:$0xff] %vm323_vm2, %v480_v13  ;;  %v304_v14 = vpop.f32.mrb[1].mxu1 }
 0x1a4   : > { %328 = vst.msk [vmem:[%s154_s27 + $0x20] sm:$0xff] %vm323_vm2, %v304_v14 }
 0x1aa   : > { %v483_v15 = vpop.f32.mrb[2].mxu1 }
 0x1ab   : > { %331 = vst.msk [vmem:[%s154_s27 + $0x38] sm:$0xff] %vm323_vm2, %v483_v15  ;;  %v314_v16 = vpop.f32.mrb[3].mxu1 }
 0x1ac   : > { %330 = vst.msk [vmem:[%s154_s27 + $0x30] sm:$0xff] %vm323_vm2, %v314_v16 }
 0x1ad   : > { %594 = shalt.err (!%p591_p6)
}
 0x1ae   : > { %s595_s16 = scalar_lea.hbm %s819_s4, 1024  ;;  %s599_s23 = scalar_lea.hbm %s871_s1, 2048 }
 0x1af   : > { %p596_p4 = scmp.ne.s32.totalorder %s819_s4, %s595_s16  ;;  %p600_p1 = scmp.lt.u32.totalorder %s819_s4, %s871_s1 }
 0x1b0   : > { %p601_p2 = scmp.lt.u32.totalorder %s599_s23, %s595_s16  ;;  %p603_p8 = scmp.lt.u32.totalorder %s595_s16, %s819_s4 }
 0x1b1   : > { %p597_p10 = pnand %p596_p4, %p880_p9 }
 0x1b2   : > { %p602_p5 = por %p601_p2, %p600_p1 }
 0x1b3   : > { %p598_p12 = pneg %p597_p10 }
 0x1b4   : > { %p604_p11 = por %p603_p8, %p602_p5 }
 0x1b6   : > { %p605_p0 = pnand %p604_p11, %p598_p12 }
 0x1b8   : > { %608 = shalt.err (!%p605_p0)
}
 0x1b9   : > { %s667_s28 = smov 128   ;;  %s668_s18 = smov 8  }
 0x1ba   : > { %488 = dma.vmem_to_hbm [thread:$0]  (%p880_p9), %s814_s29, 1024, %s819_s4, %s333_s5, %s667_s28, %s667_s28, %s668_s18  }
 0x1bb PF: > { %s364_s27 = sand.u32 1, %s643_s6   ;;  %p881_p7 = scmp.ne.s32.totalorder %s876_s21, 0 }
 0x1bc   : > { %p882_p13 = scmp.ge.s32.totalorder %s663_s11, 2  ;;  %s365_s30 = scalar_lea.sflag [#allocation4], %s364_s27 }
 0x1be   : > { %p495_p3 = pnand %p882_p13, %p881_p7 }
 0x1c0   : > { %638 = dma.done.wait (!%p495_p3), %s365_s30, 1024  }
 0x1c1   : > { %640 = vsyncadd (!%p495_p3), %s365_s30, 4294966272  ;;  %s17_s11 = sadd.s32 1, %s663_s11   ;;  %s883_s6 = smov %s647_s7 }
 0x1c2   : > { %p14_p6 = scmp.ge.s32.totalorder %s17_s11, 4   ;;  %s884_s7 = smov %s651_s8 }
 0x1c3   : > { %s885_s8 = smov %s735_s20  ;;  %s886_s9 = smov %s659_s10 }
 0x1c4   : > { %s887_s10 = smov %s889_s14  ;;  %16 = sbr.rel (!%p14_p6) target bundleno = 6 (0x6), region = 69 }
 0x1cb   :  { %370 = vsyncpa [#allocation3], 1 }
 0x1cc   :  { %372 = vsyncpa [#allocation3 + $0x1], 1 }
 0x1cd   :  { %373 = vsyncpa [#allocation4], 1 }
 0x1ce   :  { %375 = vsyncpa [#allocation4 + $0x1], 1 }

</bundles_post_ra>
